<compile_context>
chip_gen: v7x
topology: tpu7x:2x2x1
jax: 0.10.0
libtpu: 0.0.40
codegen_flags: <defaults>
</compile_context>

<pallas_src>
import functools

import jax
import jax.numpy as jnp
from jax.experimental import pallas as pl
from jax.experimental.pallas import tpu as pltpu


def _focal_loss_kernel(logits_ref, target_ref, out_ref, *, gamma):
    x = logits_ref[...].astype(jnp.float32)                 # (TN, C)
    tn, c = x.shape

    # Numerically-stable log-sum-exp along the class (lane) axis.
    m = jnp.max(x, axis=-1, keepdims=True)                  # (TN, 1)
    z = x - m
    lse = jnp.log(jnp.sum(jnp.exp(z), axis=-1, keepdims=True))  # (TN, 1)

    # Gather the target-class shifted logit with a lane select (no full-tile
    # prob / focal-power computation).
    tgt = target_ref[...]                                   # (TN, 1) int32
    cls_ids = jax.lax.broadcasted_iota(jnp.int32, (tn, c), 1)
    z_t = jnp.sum(jnp.where(cls_ids == tgt, z, 0.0), axis=-1, keepdims=True)

    # Focal-weighted NLL on per-row scalars only.
    lp_t = z_t - lse                                        # log p_target (TN, 1)
    p_t = jnp.exp(lp_t)
    valid = jnp.logical_and(tgt >= 0, tgt < c)              # masks padded rows
    # TODO(synk): PyTorch nll_loss's ignore_index=-100 rows are masked out of
    # the sum here but still counted in the mean denominator (matches the
    # reference module when no ignored labels are present).
    loss_i = jnp.where(valid, -((1.0 - p_t) ** gamma) * lp_t, 0.0)

    partial = jnp.sum(loss_i)                               # scalar tile partial
    out_ref[...] = jnp.zeros(out_ref.shape, jnp.float32) + partial


def focal_loss(logits, targets, gamma=5, row_tile=None):
    """Pallas impl of FocalLoss(weight=None, gamma, reduction='none').forward().mean()."""
    n, c = logits.shape
    itemsize = jnp.dtype(logits.dtype).itemsize
    padded_c = ((c + 127) // 128) * 128                     # lane padding of C

    # Row tile: keep a double-buffered input block well under the scoped VMEM
    # default on every generation (v5e 16 MiB, v6e/v7x 32 MiB).
    if row_tile is None:
        per_buffer_budget = 2 * 1024 * 1024                 # bytes per input buffer
        row_tile = per_buffer_budget // (padded_c * itemsize)
    tn = max(16, min((row_tile // 16) * 16, 512, ((n + 15) // 16) * 16))

    num_tiles = pl.cdiv(n, tn)
    n_pad = num_tiles * tn

    tgt2d = targets.astype(jnp.int32).reshape(n, 1)
    if n_pad != n:
        logits = jnp.pad(logits, ((0, n_pad - n), (0, 0)))
        tgt2d = jnp.pad(tgt2d, ((0, n_pad - n), (0, 0)), constant_values=-1)

    out = pl.pallas_call(
        functools.partial(_focal_loss_kernel, gamma=gamma),
        out_shape=jax.ShapeDtypeStruct((num_tiles * 8, 128), jnp.float32),
        grid=(num_tiles,),
        in_specs=[
            pl.BlockSpec((tn, c), lambda i: (i, 0)),        # logits row tile
            pl.BlockSpec((tn, 1), lambda i: (i, 0)),        # targets row tile
        ],
        out_specs=pl.BlockSpec((8, 128), lambda i: (i, 0)), # per-tile partial
        compiler_params=pltpu.CompilerParams(
            dimension_semantics=("parallel",),
            vmem_limit_bytes=32 * 1024 * 1024,
        ),
        cost_estimate=pl.CostEstimate(
            flops=6 * n_pad * c + 16 * n_pad,
            transcendentals=n_pad * c + 2 * n_pad,
            bytes_accessed=n_pad * c * itemsize + n_pad * 4 + num_tiles * 8 * 128 * 4,
        ),
    )(logits, tgt2d)

    partials = out.reshape(num_tiles, 8, 128)[:, 0, 0]      # one scalar per tile
    return jnp.sum(partials) * jnp.float32(1.0 / n)         # mean over real N


def _focal_loss_ref(logits, targets, gamma=5):
    log_prob = jax.nn.log_softmax(logits.astype(jnp.float32), axis=-1)
    prob = jnp.exp(log_prob)
    focal = (1.0 - prob) ** gamma * log_prob
    picked = jnp.take_along_axis(
        focal, targets[:, None].astype(jnp.int32), axis=-1)[:, 0]
    return jnp.mean(-picked)


if __name__ == "__main__":
    key = jax.random.PRNGKey(0)
    k1, k2, k3, k4 = jax.random.split(key, 4)

    # Small shape consistent with the module: batch of 8 samples, 16 classes.
    N, C = 8, 16
    logits = jax.random.normal(k1, (N, C), dtype=jnp.float32)
    targets = jax.random.randint(k2, (N,), 0, C, dtype=jnp.int32)

    loss = focal_loss(logits, targets, gamma=5)
    jax.block_until_ready(loss)
    ref = _focal_loss_ref(logits, targets, gamma=5)
    assert jnp.allclose(loss, ref, atol=1e-5, rtol=1e-5), (loss, ref)

    # Second check: non-aligned N with a small row tile to exercise the grid,
    # row padding and target masking paths.
    N2, C2 = 100, 40
    logits2 = jax.random.normal(k3, (N2, C2), dtype=jnp.float32)
    targets2 = jax.random.randint(k4, (N2,), 0, C2, dtype=jnp.int32)

    loss2 = focal_loss(logits2, targets2, gamma=5, row_tile=32)
    jax.block_until_ready(loss2)
    ref2 = _focal_loss_ref(logits2, targets2, gamma=5)
    assert jnp.allclose(loss2, ref2, atol=1e-5, rtol=1e-5), (loss2, ref2)

    print("KERNEL_OK")
</pallas_src>

<mosaic_0001>
module attributes {stable_mosaic.version = 11 : i64} {
  func.func @_focal_loss_kernel(%arg0: i32, %arg1: memref<16x16xf32, #tpu.memory_space<vmem>>, %arg2: memref<16x1xi32, #tpu.memory_space<vmem>>, %arg3: memref<8x128xf32, #tpu.memory_space<vmem>>) attributes {dimension_semantics = [#tpu.dimension_semantics<parallel>], iteration_bounds = array<i64: 1>, scalar_prefetch = 0 : i64, scratch_operands = 0 : i64, tpu.core_type = #tpu.core_type<tc>, window_params = [{transform_indices = @transform_0, window_bounds = array<i64: 16, 16>}, {transform_indices = @transform_1, window_bounds = array<i64: 16, 1>}, {transform_indices = @transform_2, window_bounds = array<i64: 8, 128>}]} {
    %c0 = arith.constant 0 : index
    %c0_0 = arith.constant 0 : index
    %0 = vector.load %arg1[%c0, %c0_0] : memref<16x16xf32, #tpu.memory_space<vmem>>, vector<16x16xf32>
    %cst = arith.constant dense<0xFF800000> : vector<16xf32>
    %1 = vector.multi_reduction <maximumf>, %0, %cst [1] : vector<16x16xf32> to vector<16xf32>
    %2 = vector.shape_cast %1 : vector<16xf32> to vector<16x1xf32>
    %3 = vector.broadcast %2 : vector<16x1xf32> to vector<16x16xf32>
    %4 = arith.subf %0, %3 : vector<16x16xf32>
    %5 = math.exp %4 : vector<16x16xf32>
    %cst_1 = arith.constant dense<0.000000e+00> : vector<16xf32>
    %6 = vector.multi_reduction <add>, %5, %cst_1 [1] : vector<16x16xf32> to vector<16xf32>
    %7 = vector.shape_cast %6 : vector<16xf32> to vector<16x1xf32>
    %8 = math.log %7 : vector<16x1xf32>
    %c0_2 = arith.constant 0 : index
    %c0_3 = arith.constant 0 : index
    %9 = vector.load %arg2[%c0_2, %c0_3] : memref<16x1xi32, #tpu.memory_space<vmem>>, vector<16x1xi32>
    %10 = tpu.iota {dimensions = array<i32: 1>} : vector<16x16xi32>
    %11 = vector.broadcast %9 : vector<16x1xi32> to vector<16x16xi32>
    %12 = arith.cmpi eq, %10, %11 : vector<16x16xi32>
    %cst_4 = arith.constant 0.000000e+00 : f32
    %13 = vector.broadcast %cst_4 : f32 to vector<16x16xf32>
    %14 = arith.select %12, %4, %13 : vector<16x16xi1>, vector<16x16xf32>
    %cst_5 = arith.constant dense<0.000000e+00> : vector<16xf32>
    %15 = vector.multi_reduction <add>, %14, %cst_5 [1] : vector<16x16xf32> to vector<16xf32>
    %16 = vector.shape_cast %15 : vector<16xf32> to vector<16x1xf32>
    %17 = arith.subf %16, %8 : vector<16x1xf32>
    %18 = math.exp %17 : vector<16x1xf32>
    %c0_i32 = arith.constant 0 : i32
    %19 = vector.broadcast %c0_i32 : i32 to vector<16x1xi32>
    %20 = arith.cmpi sge, %9, %19 : vector<16x1xi32>
    %c16_i32 = arith.constant 16 : i32
    %21 = vector.broadcast %c16_i32 : i32 to vector<16x1xi32>
    %22 = arith.cmpi slt, %9, %21 : vector<16x1xi32>
    %23 = arith.andi %20, %22 : vector<16x1xi1>
    %cst_6 = arith.constant 1.000000e+00 : f32
    %24 = vector.broadcast %cst_6 : f32 to vector<16x1xf32>
    %25 = arith.subf %24, %18 : vector<16x1xf32>
    %26 = arith.mulf %25, %25 : vector<16x1xf32>
    %27 = arith.mulf %26, %26 : vector<16x1xf32>
    %28 = arith.mulf %25, %27 : vector<16x1xf32>
    %cst_7 = arith.constant 0.000000e+00 : f32
    %29 = vector.broadcast %cst_7 : f32 to vector<16x1xf32>
    %30 = arith.subf %29, %28 : vector<16x1xf32>
    %31 = arith.mulf %30, %17 : vector<16x1xf32>
    %cst_8 = arith.constant 0.000000e+00 : f32
    %32 = vector.broadcast %cst_8 : f32 to vector<16x1xf32>
    %33 = arith.select %23, %31, %32 : vector<16x1xi1>, vector<16x1xf32>
    %34 = vector.shape_cast %33 : vector<16x1xf32> to vector<1x16x1xf32>
    %cst_9 = arith.constant dense<0.000000e+00> : vector<1xf32>
    %35 = vector.multi_reduction <add>, %34, %cst_9 [1, 2] : vector<1x16x1xf32> to vector<1xf32>
    %36 = vector.shape_cast %35 : vector<1xf32> to vector<1x1x1xf32>
    %37 = vector.extract %36[0, 0, 0] : f32 from vector<1x1x1xf32>
    %cst_10 = arith.constant 0.000000e+00 : f32
    %38 = vector.broadcast %cst_10 : f32 to vector<8x128xf32>
    %39 = vector.broadcast %37 : f32 to vector<8x128xf32>
    %40 = arith.addf %38, %39 : vector<8x128xf32>
    %c0_11 = arith.constant 0 : index
    %c0_12 = arith.constant 0 : index
    %41 = vector.load %arg3[%c0_11, %c0_12] : memref<8x128xf32, #tpu.memory_space<vmem>>, vector<8x128xf32>
    tpu.vector_store %arg3[%c0_11, %c0_12], %40 {strides = array<i32>} : memref<8x128xf32, #tpu.memory_space<vmem>>, vector<8x128xf32>,
    return
  }
  func.func @transform_0(%arg0: i32) -> (i32, i32) {
    %c0_i32 = arith.constant 0 : i32
    %c0_i32_0 = arith.constant 0 : i32
    return %arg0, %c0_i32 : i32, i32
  }
  func.func @transform_1(%arg0: i32) -> (i32, i32) {
    %c0_i32 = arith.constant 0 : i32
    %c0_i32_0 = arith.constant 0 : i32
    return %arg0, %c0_i32 : i32, i32
  }
  func.func @transform_2(%arg0: i32) -> (i32, i32) {
    %c0_i32 = arith.constant 0 : i32
    %c0_i32_0 = arith.constant 0 : i32
    return %arg0, %c0_i32 : i32, i32
  }
}

</mosaic_0001>

<bundles_post_ra>
// kernel: tpu_custom_call.1
= control target key start
LH: loop header
LB: loop body
LE: loop exit
PB: predicated region body
PF: predicated region fallthrough
CT: control target
= control target key end

     0   :  { %vm14_vm0 = vcmask 130048   ;;  %v155_v4 = vmov 0   ;;  %s212_s0 = inlined_call_operand.vmem [shape: f32[16,16], index: 0, kind: input, shape index: {}]   ;;  %s213_s1 = inlined_call_operand.vmem [shape: s32[16,1], index: 1, kind: input, shape index: {}]   ;;  %s214_s2 = inlined_call_operand.hbm [shape: f32[8,128], index: 2, kind: output, shape index: {}]  }
   0x1   :  { %v12_v0 = vld [vmem:[%s212_s0] sm:$0xff]  ;;  %v13_v1 = vld [vmem:[%s212_s0 + $0x8] sm:$0xff]  ;;  %117 = vset.pattern.permute.xlu1 %v155_v4  ;;  %118 = vset.pattern.permute.xlu0 %v155_v4 }
   0x2   :  { %v181_v2 = vld [vmem:[%s213_s1] sm:$0xff]  ;;  %v15_v3 = vsel %vm14_vm0, %v12_v0, -inf }
   0x3   :  { %16 = vmax.xlane.f32.xlu0 %v15_v3  ;;  %42 = vperm.xlu1 %117, %v181_v2  }
   0x4   :  { %7 = vsyncpa [#allocation3], 0  ;;  %v18_v5 = vsel %vm14_vm0, %v13_v1, -inf  ;;  %v189_v6 = vld [vmem:[%s213_s1 + $0x8] sm:$0xff]  ;;  %v39_v12 = vlaneseq  ;;  %vm63_vm3 = vcmp.ge.s32.totalorder %v181_v2, 0  ;;  %vm65_vm4 = vcmp.lt.s32.totalorder %v181_v2, 16 }
   0x5   :  { %vm64_vm5 = vcmp.ge.s32.totalorder %v189_v6, 0  ;;  %vm66_vm6 = vcmp.lt.s32.totalorder %v189_v6, 16  ;;  %vm67_vm7 = vmand %vm63_vm3, %vm65_vm4  ;;  %vm83_vm9 = vcmask 7168   ;;  %s156_s0 = smov [#allocation2]  }
   0x6   :  { %v40_v15 = vand.u32 127, %v39_v12  ;;  %vm68_vm8 = vmand %vm64_vm5, %vm66_vm6  ;;  %s105_s1 = sshll.u32 %s156_s0, 4  ;;  %s106_s1 = int_to_ptr.vmem [resolvable:$true] %s105_s1 }
   0x7   :  { %19 = vmax.xlane.f32.xlu0 %v18_v5  ;;  %45 = vperm.xlu1 %117, %v189_v6   ;;  %s131_s18 = scalar_lea.vmem %s106_s1, 128  ;;  %p136_p1 = scmp.lt.s32.totalorder %s106_s1, %s106_s1 }
   0x8   :  { %p132_p0 = scmp.ne.s32.totalorder %s106_s1, %s131_s18  ;;  %p137_p2 = scmp.lt.s32.totalorder %s131_s18, %s131_s18 }
   0xa   :  { %p138_p3 = por %p137_p2, %p136_p1 }
   0xc   :  { %p139_p4 = pnand %p138_p3, %p132_p0 }
  0x82   :  { %v43_v14 = vpop.permute.xlu1 %42 }
  0x83   :  { %vm47_vm1 = vcmp.eq.s32.totalorder %v40_v15, %v43_v14 }
  0x86   :  { %v46_v17 = vpop.permute.xlu1 %45 }
  0x87   :  { %vm48_vm2 = vcmp.eq.s32.totalorder %v40_v15, %v46_v17 }
  0x90   :  { %v17_v7 = vpop.xlane.xlu0 %16 }
  0x91   :  { %v21_v8 = vsub.f32 %v12_v0, %v17_v7 }
  0x93   :  { %v23_v9 = vmul.f32 1.442695, %v21_v8  ;;  %v49_v19 = vsel %vm47_vm1, %v21_v8, 0.0 }
  0x94   :  { %v20_v10 = vpop.xlane.xlu0 %19  ;;  %v51_v21 = vsel %vm14_vm0, %v49_v19, 0.0 }
  0x95   :  { %119 = vpow2.f32 %v23_v9  ;;  %v22_v11 = vsub.f32 %v13_v1, %v20_v10 }
  0x97   :  { %v25_v13 = vmul.f32 1.442695, %v22_v11  ;;  %v50_v23 = vsel %vm48_vm2, %v22_v11, 0.0 }
  0x98   :  { %v54_v24 = vsel %vm14_vm0, %v50_v23, 0.0 }
  0x99   :  { %121 = vpow2.f32 %v25_v13 }
  0x9f   :  { %v120_v16 = vpop.eup %119 }
  0xa0   :  { %v27_v18 = vsel %vm14_vm0, %v120_v16, 0.0 }
  0xa1   :  { %28 = vadd.xlane.f32.xlu0 %v27_v18 }
  0xa3   :  { %v122_v20 = vpop.eup %121 }
  0xa4   :  { %v30_v22 = vsel %vm14_vm0, %v122_v20, 0.0 }
  0xa5   :  { %52 = vadd.xlane.f32.xlu0 %v51_v21  ;;  %31 = vadd.xlane.f32.xlu1 %v30_v22 }
  0xa9   :  { %55 = vadd.xlane.f32.xlu0 %v54_v24 }
 0x12e   :  { %v29_v25 = vpop.xlane.xlu0 %28 }
 0x12f   :  { %123 = vlog2.f32 %v29_v25 }
 0x132   :  { %v32_v26 = vpop.xlane.xlu1 %31  ;;  %v53_v28 = vpop.xlane.xlu0 %52 }
 0x133   :  { %125 = vlog2.f32 %v32_v26 }
 0x136   :  { %v56_v34 = vpop.xlane.xlu0 %55 }
 0x139   :  { %v124_v27 = vpop.eup %123 }
 0x13a   :  { %v34_v29 = vmul.f32 0.6931472, %v124_v27 }
 0x13c   :  { %v57_v30 = vsub.f32 %v53_v28, %v34_v29 }
 0x13d   :  { %v126_v31 = vpop.eup %125 }
 0x13e   :  { %v59_v32 = vmul.f32 1.442695, %v57_v30  ;;  %v36_v33 = vmul.f32 0.6931472, %v126_v31 }
 0x140   :  { %127 = vpow2.f32 %v59_v32  ;;  %v58_v35 = vsub.f32 %v56_v34, %v36_v33 }
 0x142   :  { %v61_v36 = vmul.f32 1.442695, %v58_v35 }
 0x144   :  { %129 = vpow2.f32 %v61_v36 }
 0x14a   :  { %v128_v37 = vpop.eup %127 }
 0x14b   :  { %v69_v38 = vsub.f32 1.0, %v128_v37 }
 0x14d   :  { %v71_v39 = vmul.f32 %v69_v38, %v69_v38 }
 0x14e   :  { %v130_v40 = vpop.eup %129 }
 0x14f   :  { %v73_v41 = vmul.f32 %v71_v39, %v71_v39  ;;  %v70_v42 = vsub.f32 1.0, %v130_v40 }
 0x151   :  { %v75_v43 = vmul.f32 %v73_v41, %v69_v38  ;;  %v72_v44 = vmul.f32 %v70_v42, %v70_v42 }
 0x153   :  { %v77_v45 = vsub.f32 0.0, %v75_v43  ;;  %v74_v46 = vmul.f32 %v72_v44, %v72_v44 }
 0x155   :  { %v79_v47 = vmul.f32 %v77_v45, %v57_v30  ;;  %v76_v48 = vmul.f32 %v74_v46, %v70_v42 }
 0x157   :  { %v78_v49 = vsub.f32 0.0, %v76_v48  ;;  %v81_v51 = vsel %vm67_vm7, %v79_v47, 0.0 }
 0x158   :  { %v84_v53 = vsel %vm83_vm9, %v81_v51, 0.0 }
 0x159   :  { %v80_v50 = vmul.f32 %v78_v49, %v58_v35 }
 0x15b   :  { %v82_v52 = vsel %vm68_vm8, %v80_v50, 0.0 }
 0x15c   :  { %v85_v54 = vsel %vm83_vm9, %v82_v52, 0.0 }
 0x15d   :  { %v86_v55 = vadd.f32 %v85_v54, %v84_v53 }
 0x15f   :  { %87 = vadd.xlane.f32.xlu0 %v86_v55 }
 0x1ec   :  { %v88_v56 = vpop.xlane.xlu0 %87 }
 0x1ed   :  { %v89_v57 = vrot.slane %v88_v56, 4 }
 0x1ef   :  { %v90_v58 = vadd.f32 %v89_v57, %v88_v56 }
 0x1f1   :  { %v91_v59 = vrot.slane %v90_v58, 2 }
 0x1f3   :  { %v92_v60 = vadd.f32 %v91_v59, %v90_v58 }
 0x1f5   :  { %v93_v61 = vrot.slane %v92_v60, 1 }
 0x1f7   :  { %v94_v62 = vadd.f32 %v93_v61, %v92_v60 }
 0x1f9   :  { %113 = vpush %v94_v62 }
 0x22a   :  { %s114_s17 = spop %113 }
 0x22b   :  { %v96_v63 = vstv %s114_s17 }
 0x22c   :  { %98 = vst [vmem:[#allocation2] sm:$0xff] %v96_v63 }
 0x22d   :  { %142 = shalt.err (!%p139_p4)
}
 0x22e   :  { %s143_s21 = scalar_lea.hbm %s214_s2, 128 }
 0x22f   :  { %p144_p5 = scmp.ne.s32.totalorder %s214_s2, %s143_s21  ;;  %p147_p6 = scmp.lt.u32.totalorder %s143_s21, %s214_s2 }
 0x231   :  { %p149_p7 = pnand %p147_p6, %p144_p5 }
 0x233   :  { %152 = shalt.err (!%p149_p7)
}
 0x234   :  { %108 = dma.vmem_to_hbm [thread:$0]  %s106_s1, 128, %s214_s2, [#allocation3]  }
 0x235   :  { %153 = dma.done.wait [#allocation3], 128  }
 0x236   :  { %154 = vsyncadd [#allocation3], 4294967168 }
 0x237   :  { %112 = vsyncpa [#allocation3], 1 }

</bundles_post_ra>
